<compile_context>
chip_gen: v7x
topology: tpu7x:2x2x1
jax: 0.10.0
libtpu: 0.0.40
codegen_flags: <defaults>
</compile_context>

<pallas_src>
import functools

import jax
import jax.numpy as jnp
from jax.experimental import pallas as pl
from jax.experimental.pallas import tpu as pltpu


# ----------------------------------------------------------------------------- kernels


def _ce_dense_kernel(preds_ref, labels_ref, out_ref, acc_ref, *,
                     inv_total_rows, block_b, tiles_per_split, total_rows, needs_mask):
    """Grid = (num_splits, batch_tiles). Dense (soft or one-hot) labels."""
    c = pl.program_id(0)
    j = pl.program_id(1)

    @pl.when(j == 0)
    def _():
        acc_ref[...] = jnp.zeros_like(acc_ref)

    x = preds_ref[...].astype(jnp.float32)      # (tb, C)
    lbl = labels_ref[...].astype(jnp.float32)   # (tb, C)

    # Numerically stable logsumexp along the class (lane) axis.
    m = jnp.max(x, axis=-1, keepdims=True)                           # (tb, 1)
    lse = jnp.log(jnp.sum(jnp.exp(x - m), axis=-1, keepdims=True))   # (tb, 1)

    lbl_sum = jnp.sum(lbl, axis=-1, keepdims=True)                   # (tb, 1)
    lbl_dot = jnp.sum(lbl * x, axis=-1, keepdims=True)               # (tb, 1)

    # sum_c(-lbl_c * log_softmax(x)_c) == sum(lbl) * (m + lse) - sum(lbl * x)
    # NOTE: a -inf logit paired with a zero label yields 0*(-inf)=NaN, identical to the
    # reference -labels*log_softmax(preds) behavior.
    per_row = lbl_sum * (m + lse) - lbl_dot                           # (tb, 1)

    if needs_mask:
        row0 = (c * tiles_per_split + j) * block_b
        rows = row0 + jax.lax.broadcasted_iota(jnp.int32, per_row.shape, 0)
        per_row = jnp.where(rows < total_rows, per_row, 0.0)

    acc_ref[...] = acc_ref[...] + jnp.sum(per_row, keepdims=True)     # (1, 1)

    @pl.when(j == pl.num_programs(1) - 1)
    def _():
        out_ref[...] = (acc_ref[...] * inv_total_rows).reshape(1, 1, 1)


def _ce_index_kernel(preds_ref, idx_ref, out_ref, acc_ref, *,
                     inv_total_rows, block_b, tiles_per_split, total_rows, needs_mask):
    """Grid = (num_splits, batch_tiles). Labels given as int32 class indices (B, 1)."""
    c = pl.program_id(0)
    j = pl.program_id(1)

    @pl.when(j == 0)
    def _():
        acc_ref[...] = jnp.zeros_like(acc_ref)

    x = preds_ref[...].astype(jnp.float32)                            # (tb, C)
    idx = idx_ref[...]                                                # (tb, 1) int32

    m = jnp.max(x, axis=-1, keepdims=True)                            # (tb, 1)
    lse = jnp.log(jnp.sum(jnp.exp(x - m), axis=-1, keepdims=True))    # (tb, 1)

    cls = jax.lax.broadcasted_iota(jnp.int32, x.shape, 1)             # (tb, C)
    x_sel = jnp.sum(jnp.where(cls == idx, x, 0.0), axis=-1, keepdims=True)  # (tb, 1)

    # One-hot labels: lbl_sum == 1, lbl_dot == x[idx].
    per_row = (m + lse) - x_sel                                       # (tb, 1)

    if needs_mask:
        row0 = (c * tiles_per_split + j) * block_b
        rows = row0 + jax.lax.broadcasted_iota(jnp.int32, per_row.shape, 0)
        per_row = jnp.where(rows < total_rows, per_row, 0.0)

    acc_ref[...] = acc_ref[...] + jnp.sum(per_row, keepdims=True)     # (1, 1)

    @pl.when(j == pl.num_programs(1) - 1)
    def _():
        out_ref[...] = (acc_ref[...] * inv_total_rows).reshape(1, 1, 1)


# ----------------------------------------------------------------------------- wrappers


def _device_config():
    """Generation-aware defaults (num_splits, tile budget, vmem limit)."""
    kind = ""
    try:
        kind = jax.devices()[0].device_kind.lower()
    except Exception:
        pass
    if "7" in kind:
        # v7x: 2 TensorCores/chip, 64 MiB VMEM per TC -> 2-way core-parallel split,
        # cap the scoped VMEM well under the physical ceiling.
        return dict(num_splits=2, core_parallel=True,
                    tile_budget=20 << 20, vmem_limit=48 << 20)
    if ("v5" in kind) or ("v6" in kind):
        # v5e / v6e: single TensorCore, 128 MiB VMEM -> no split, fat tiles.
        return dict(num_splits=1, core_parallel=False,
                    tile_budget=28 << 20, vmem_limit=64 << 20)
    # Unknown / older generations: stay conservative.
    return dict(num_splits=1, core_parallel=False,
                tile_budget=8 << 20, vmem_limit=None)


def _round_up(x, m):
    return -(-x // m) * m


def _launch(kernel, preds2, second, second_block_cols, per_row_bytes, sublane,
            num_splits, core_parallel, tile_budget, vmem_limit, max_block_b):
    B, C = preds2.shape

    # Biggest batch tile that fits the (double-buffered) VMEM budget.
    cap = max(sublane, tile_budget // per_row_bytes)
    cap = min(cap, max_block_b)
    cap = max(sublane, (cap // sublane) * sublane)

    rows_per_split = -(-B // num_splits)                       # cdiv
    block_b = min(cap, _round_up(rows_per_split, sublane))
    tiles_per_split = -(-rows_per_split // block_b)
    last_block = -(-B // block_b) - 1                          # last block touching real data
    needs_mask = (num_splits * tiles_per_split * block_b) != B

    def in_idx(c, j):
        b = c * tiles_per_split + j
        if needs_mask:
            # Fully-out-of-range tiles re-read the last valid tile; their rows are masked
            # to zero in-kernel, so no OOB DMA and no wrapper-side padding copy is needed.
            b = jnp.minimum(b, last_block)
        return (b, 0)

    kern = functools.partial(
        kernel, inv_total_rows=1.0 / float(B), block_b=block_b,
        tiles_per_split=tiles_per_split, total_rows=B, needs_mask=needs_mask)

    arb = getattr(pltpu, "ARBITRARY", "arbitrary")
    if core_parallel and num_splits > 1:
        lead = getattr(pltpu, "CORE_PARALLEL", "parallel")
    else:
        lead = arb

    cost = pl.CostEstimate(
        flops=6 * B * C,
        transcendentals=B * C,
        bytes_accessed=int(preds2.size) * preds2.dtype.itemsize
        + int(second.size) * second.dtype.itemsize
        + 4 * num_splits,
    )

    partials = pl.pallas_call(
        kern,
        out_shape=jax.ShapeDtypeStruct((num_splits, 1, 1), jnp.float32),
        grid_spec=pltpu.PrefetchScalarGridSpec(
            num_scalar_prefetch=0,
            grid=(num_splits, tiles_per_split),
            in_specs=[
                pl.BlockSpec((block_b, C), in_idx),
                pl.BlockSpec((block_b, second_block_cols), in_idx),
            ],
            out_specs=pl.BlockSpec((1, 1, 1), lambda c, j: (c, 0, 0)),
            # Each TensorCore has its own VMEM, so the (1,1) accumulator is per-core
            # under CORE_PARALLEL; each split also writes its own output block.
            scratch_shapes=[pltpu.VMEM((1, 1), jnp.float32)],
        ),
        compiler_params=pltpu.CompilerParams(
            dimension_semantics=(lead, arb),
            vmem_limit_bytes=vmem_limit,
        ),
        cost_estimate=cost,
    )(preds2, second)

    return jnp.sum(partials)


def cross_entropy_one_hot(preds, labels, *, num_splits=None, tile_budget_bytes=None,
                          vmem_limit_bytes=None, max_block_b=8192):
    """Module-equivalent dense-label path. preds, labels: (..., C). Returns scalar f32."""
    assert preds.shape == labels.shape
    C = preds.shape[-1]
    preds2 = preds.reshape(-1, C)
    labels2 = labels.reshape(-1, C)

    cfg = _device_config()
    num_splits = cfg["num_splits"] if num_splits is None else num_splits
    tile_budget = cfg["tile_budget"] if tile_budget_bytes is None else tile_budget_bytes
    vmem_limit = cfg["vmem_limit"] if vmem_limit_bytes is None else vmem_limit_bytes

    p_bytes = jnp.dtype(preds2.dtype).itemsize
    l_bytes = jnp.dtype(labels2.dtype).itemsize
    min_bytes = min(p_bytes, l_bytes)
    sublane = 8 if min_bytes >= 4 else (16 if min_bytes == 2 else 32)
    per_row_bytes = 2 * C * (p_bytes + l_bytes)   # both inputs, double-buffered

    return _launch(_ce_dense_kernel, preds2, labels2, C, per_row_bytes, sublane,
                   num_splits, cfg["core_parallel"], tile_budget, vmem_limit, max_block_b)


def cross_entropy_from_indices(preds, label_idx, *, num_splits=None, tile_budget_bytes=None,
                               vmem_limit_bytes=None, max_block_b=8192):
    """Fast path when labels are exactly one-hot: label_idx has shape preds.shape[:-1]."""
    C = preds.shape[-1]
    preds2 = preds.reshape(-1, C)
    idx2 = label_idx.reshape(-1, 1).astype(jnp.int32)
    assert idx2.shape[0] == preds2.shape[0]

    cfg = _device_config()
    num_splits = cfg["num_splits"] if num_splits is None else num_splits
    tile_budget = cfg["tile_budget"] if tile_budget_bytes is None else tile_budget_bytes
    vmem_limit = cfg["vmem_limit"] if vmem_limit_bytes is None else vmem_limit_bytes

    p_bytes = jnp.dtype(preds2.dtype).itemsize
    sublane = 8 if p_bytes >= 4 else (16 if p_bytes == 2 else 32)
    per_row_bytes = 2 * (C * p_bytes + 4)         # logits + int32 index, double-buffered

    return _launch(_ce_index_kernel, preds2, idx2, 1, per_row_bytes, sublane,
                   num_splits, cfg["core_parallel"], tile_budget, vmem_limit, max_block_b)


def _reference(preds, labels):
    log_sm = jax.nn.log_softmax(preds.astype(jnp.float32), axis=-1)
    return jnp.mean(jnp.sum(-labels.astype(jnp.float32) * log_sm, axis=-1))


if __name__ == "__main__":
    key = jax.random.PRNGKey(0)
    k1, k2, k3, k4 = jax.random.split(key, 4)

    # Test 1: one-hot labels, batch divisible by tile -- dense path and index fast path.
    B, C = 16, 128
    preds = jax.random.normal(k1, (B, C), dtype=jnp.float32)
    label_idx = jax.random.randint(k2, (B,), 0, C)
    labels = jax.nn.one_hot(label_idx, C, dtype=jnp.float32)

    ref = _reference(preds, labels)
    loss_dense = jax.block_until_ready(cross_entropy_one_hot(preds, labels))
    loss_idx = jax.block_until_ready(cross_entropy_from_indices(preds, label_idx))
    assert jnp.allclose(loss_dense, ref, atol=1e-4, rtol=1e-5), (loss_dense, ref)
    assert jnp.allclose(loss_idx, ref, atol=1e-4, rtol=1e-5), (loss_idx, ref)

    # Test 2: ragged batch (exercises in-kernel tail masking, no jnp.pad) + soft labels.
    B2, C2 = 13, 256
    preds_r = jax.random.normal(k3, (B2, C2), dtype=jnp.float32)
    soft_labels = jax.nn.softmax(jax.random.normal(k4, (B2, C2), dtype=jnp.float32), axis=-1)
    ref2 = _reference(preds_r, soft_labels)
    loss2 = jax.block_until_ready(cross_entropy_one_hot(preds_r, soft_labels))
    assert jnp.allclose(loss2, ref2, atol=1e-4, rtol=1e-5), (loss2, ref2)

    # Test 3: ragged one-hot via the index path + bf16 dense labels (reduced label bytes).
    B3, C3 = 13, 128
    preds3 = jax.random.normal(k2, (B3, C3), dtype=jnp.float32)
    idx3 = jax.random.randint(k4, (B3,), 0, C3)
    labels3_bf16 = jax.nn.one_hot(idx3, C3, dtype=jnp.bfloat16)
    ref3 = _reference(preds3, labels3_bf16)
    loss3_idx = jax.block_until_ready(cross_entropy_from_indices(preds3, idx3))
    loss3_bf16 = jax.block_until_ready(cross_entropy_one_hot(preds3, labels3_bf16))
    assert jnp.allclose(loss3_idx, ref3, atol=1e-4, rtol=1e-5), (loss3_idx, ref3)
    assert jnp.allclose(loss3_bf16, ref3, atol=1e-4, rtol=1e-5), (loss3_bf16, ref3)

    print("KERNEL_OK")
</pallas_src>

<mosaic_0001>
module attributes {stable_mosaic.version = 11 : i64} {
  func.func @_ce_dense_kernel(%arg0: i32, %arg1: i32, %arg2: memref<16x128xf32, #tpu.memory_space<vmem>>, %arg3: memref<16x128xf32, #tpu.memory_space<vmem>>, %arg4: memref<1x1x1xf32, #tpu.memory_space<vmem>>, %arg5: memref<1x1xf32, #tpu.memory_space<vmem>>) attributes {dimension_semantics = [#tpu.dimension_semantics<arbitrary>, #tpu.dimension_semantics<arbitrary>], iteration_bounds = array<i64: 1, 1>, scalar_prefetch = 0 : i64, scratch_operands = 1 : i64, tpu.core_type = #tpu.core_type<tc>, window_params = [{transform_indices = @transform_0, window_bounds = array<i64: 16, 128>}, {transform_indices = @transform_1, window_bounds = array<i64: 16, 128>}, {transform_indices = @transform_2, window_bounds = array<i64: 1, 1, 1>}]} {
    %c0_i32 = arith.constant 0 : i32
    %0 = arith.cmpi eq, %arg1, %c0_i32 : i32
    %1 = arith.extui %0 : i1 to i32
    %c0_i32_0 = arith.constant 0 : i32
    %2 = arith.cmpi ne, %1, %c0_i32_0 : i32
    scf.if %2 {
      %cst_14 = arith.constant 0.000000e+00 : f32
      %32 = vector.broadcast %cst_14 : f32 to vector<1x1xf32>
      %c0_15 = arith.constant 0 : index
      %c0_16 = arith.constant 0 : index
      %33 = vector.load %arg5[%c0_15, %c0_16] : memref<1x1xf32, #tpu.memory_space<vmem>>, vector<1x1xf32>
      tpu.vector_store %arg5[%c0_15, %c0_16], %32 {strides = array<i32>} : memref<1x1xf32, #tpu.memory_space<vmem>>, vector<1x1xf32>,
    } else {
    }
    %c0 = arith.constant 0 : index
    %c0_1 = arith.constant 0 : index
    %3 = vector.load %arg2[%c0, %c0_1] : memref<16x128xf32, #tpu.memory_space<vmem>>, vector<16x128xf32>
    %c0_2 = arith.constant 0 : index
    %c0_3 = arith.constant 0 : index
    %4 = vector.load %arg3[%c0_2, %c0_3] : memref<16x128xf32, #tpu.memory_space<vmem>>, vector<16x128xf32>
    %cst = arith.constant dense<0xFF800000> : vector<16xf32>
    %5 = vector.multi_reduction <maximumf>, %3, %cst [1] : vector<16x128xf32> to vector<16xf32>
    %6 = vector.shape_cast %5 : vector<16xf32> to vector<16x1xf32>
    %7 = vector.broadcast %6 : vector<16x1xf32> to vector<16x128xf32>
    %8 = arith.subf %3, %7 : vector<16x128xf32>
    %9 = math.exp %8 : vector<16x128xf32>
    %cst_4 = arith.constant dense<0.000000e+00> : vector<16xf32>
    %10 = vector.multi_reduction <add>, %9, %cst_4 [1] : vector<16x128xf32> to vector<16xf32>
    %11 = vector.shape_cast %10 : vector<16xf32> to vector<16x1xf32>
    %12 = math.log %11 : vector<16x1xf32>
    %cst_5 = arith.constant dense<0.000000e+00> : vector<16xf32>
    %13 = vector.multi_reduction <add>, %4, %cst_5 [1] : vector<16x128xf32> to vector<16xf32>
    %14 = vector.shape_cast %13 : vector<16xf32> to vector<16x1xf32>
    %15 = arith.mulf %4, %3 : vector<16x128xf32>
    %cst_6 = arith.constant dense<0.000000e+00> : vector<16xf32>
    %16 = vector.multi_reduction <add>, %15, %cst_6 [1] : vector<16x128xf32> to vector<16xf32>
    %17 = vector.shape_cast %16 : vector<16xf32> to vector<16x1xf32>
    %18 = arith.addf %6, %12 : vector<16x1xf32>
    %19 = arith.mulf %14, %18 : vector<16x1xf32>
    %20 = arith.subf %19, %17 : vector<16x1xf32>
    %c0_7 = arith.constant 0 : index
    %c0_8 = arith.constant 0 : index
    %21 = vector.load %arg5[%c0_7, %c0_8] : memref<1x1xf32, #tpu.memory_space<vmem>>, vector<1x1xf32>
    %22 = vector.shape_cast %20 : vector<16x1xf32> to vector<1x16x1xf32>
    %cst_9 = arith.constant dense<0.000000e+00> : vector<1xf32>
    %23 = vector.multi_reduction <add>, %22, %cst_9 [1, 2] : vector<1x16x1xf32> to vector<1xf32>
    %24 = vector.shape_cast %23 : vector<1xf32> to vector<1x1x1xf32>
    %25 = vector.extract %24[0, 0, 0] : f32 from vector<1x1x1xf32>
    %26 = vector.broadcast %25 : f32 to vector<1x1xf32>
    %27 = arith.addf %21, %26 : vector<1x1xf32>
    %c0_10 = arith.constant 0 : index
    %c0_11 = arith.constant 0 : index
    %28 = vector.load %arg5[%c0_10, %c0_11] : memref<1x1xf32, #tpu.memory_space<vmem>>, vector<1x1xf32>
    tpu.vector_store %arg5[%c0_10, %c0_11], %27 {strides = array<i32>} : memref<1x1xf32, #tpu.memory_space<vmem>>, vector<1x1xf32>,
    %c0_i32_12 = arith.constant 0 : i32
    %29 = arith.cmpi eq, %arg1, %c0_i32_12 : i32
    %30 = arith.extui %29 : i1 to i32
    %c0_i32_13 = arith.constant 0 : i32
    %31 = arith.cmpi ne, %30, %c0_i32_13 : i32
    scf.if %31 {
      %c0_14 = arith.constant 0 : index
      %c0_15 = arith.constant 0 : index
      %32 = vector.load %arg5[%c0_14, %c0_15] : memref<1x1xf32, #tpu.memory_space<vmem>>, vector<1x1xf32>
      %cst_16 = arith.constant 6.250000e-02 : f32
      %33 = vector.broadcast %cst_16 : f32 to vector<1x1xf32>
      %34 = arith.mulf %32, %33 : vector<1x1xf32>
      %35 = vector.shape_cast %34 : vector<1x1xf32> to vector<1x1x1xf32>
      %c0_17 = arith.constant 0 : index
      %c0_18 = arith.constant 0 : index
      %c0_19 = arith.constant 0 : index
      %36 = vector.load %arg4[%c0_17, %c0_18, %c0_19] : memref<1x1x1xf32, #tpu.memory_space<vmem>>, vector<1x1x1xf32>
      tpu.vector_store %arg4[%c0_17, %c0_18, %c0_19], %35 {strides = array<i32>} : memref<1x1x1xf32, #tpu.memory_space<vmem>>, vector<1x1x1xf32>,
    } else {
    }
    return
  }
  func.func @transform_0(%arg0: i32, %arg1: i32) -> (i32, i32) {
    %c1_i32 = arith.constant 1 : i32
    %0 = arith.muli %arg0, %c1_i32 : i32
    %1 = arith.addi %0, %arg1 : i32
    %c0_i32 = arith.constant 0 : i32
    %c0_i32_0 = arith.constant 0 : i32
    return %1, %c0_i32 : i32, i32
  }
  func.func @transform_1(%arg0: i32, %arg1: i32) -> (i32, i32) {
    %c1_i32 = arith.constant 1 : i32
    %0 = arith.muli %arg0, %c1_i32 : i32
    %1 = arith.addi %0, %arg1 : i32
    %c0_i32 = arith.constant 0 : i32
    %c0_i32_0 = arith.constant 0 : i32
    return %1, %c0_i32 : i32, i32
  }
  func.func @transform_2(%arg0: i32, %arg1: i32) -> (i32, i32, i32) {
    %c0_i32 = arith.constant 0 : i32
    %c0_i32_0 = arith.constant 0 : i32
    %c0_i32_1 = arith.constant 0 : i32
    return %arg0, %c0_i32, %c0_i32_0 : i32, i32, i32
  }
}

</mosaic_0001>

<bundles_post_ra>
// kernel: tpu_custom_call.1
= control target key start
LH: loop header
LB: loop body
LE: loop exit
PB: predicated region body
PF: predicated region fallthrough
CT: control target
= control target key end

     0   :  { %7 = vsyncpa [#allocation4], 0  ;;  %s284_s0 = inlined_call_operand.hbm [shape: f32[16,128], index: 0, kind: input, shape index: {}]   ;;  %s285_s1 = inlined_call_operand.hbm [shape: f32[16,128], index: 1, kind: input, shape index: {}]   ;;  %s286_s2 = inlined_call_operand.hbm [shape: f32[1,1,1], index: 2, kind: output, shape index: {}]  }
   0x1   :  { %8 = vsyncpa [#allocation7], 0 }
   0x2   :  { %9 = vsyncpa [#allocation5], 0  ;;  %s224_s9 = smov [#allocation3]   ;;  %s152_s13 = scalar_lea.hbm %s284_s0, 256 }
   0x3   :  { %s19_s10 = sshll.u32 %s224_s9, 4  ;;  %p153_p0 = scmp.ne.s32.totalorder %s284_s0, %s152_s13  ;;  %s20_s10 = int_to_ptr.vmem [resolvable:$true] %s19_s10 }
   0x4   :  { %p156_p1 = scmp.lt.u32.totalorder %s152_s13, %s284_s0 }
   0x6   :  { %p158_p2 = pnand %p156_p1, %p153_p0 }
   0x8   :  { %161 = shalt.err (!%p158_p2)
}
   0x9   :  { %s162_s18 = scalar_lea.vmem %s20_s10, 256  ;;  %p167_p4 = scmp.lt.s32.totalorder %s20_s10, %s20_s10 }
   0xa   :  { %p163_p3 = scmp.ne.s32.totalorder %s20_s10, %s162_s18  ;;  %p168_p5 = scmp.lt.s32.totalorder %s162_s18, %s162_s18 }
   0xc   :  { %p169_p6 = por %p168_p5, %p167_p4 }
   0xe   :  { %p170_p7 = pnand %p169_p6, %p163_p3 }
  0x10   :  { %173 = shalt.err (!%p170_p7)
}
  0x11   :  { %s225_s19 = smov 128   ;;  %s226_s20 = smov 8  }
  0x12   :  { %25 = dma.hbm_to_vmem [thread:$0]  %s284_s0, 256, %s20_s10, [#allocation4], %s225_s19, %s225_s19, %s226_s20  }
  0x13   :  { %s227_s23 = smov [#allocation6]   ;;  %s174_s27 = scalar_lea.hbm %s285_s1, 256 }
  0x14   :  { %s35_s24 = sshll.u32 %s227_s23, 4  ;;  %p175_p8 = scmp.ne.s32.totalorder %s285_s1, %s174_s27  ;;  %s36_s24 = int_to_ptr.vmem [resolvable:$true] %s35_s24 }
  0x15   :  { %p178_p9 = scmp.lt.u32.totalorder %s174_s27, %s285_s1 }
  0x17   :  { %p180_p10 = pnand %p178_p9, %p175_p8 }
  0x19   :  { %183 = shalt.err (!%p180_p10)
}
  0x1a   :  { %s184_s4 = scalar_lea.vmem %s36_s24, 256  ;;  %p189_p12 = scmp.lt.s32.totalorder %s36_s24, %s36_s24 }
  0x1b   :  { %p185_p11 = scmp.ne.s32.totalorder %s36_s24, %s184_s4  ;;  %p190_p13 = scmp.lt.s32.totalorder %s184_s4, %s184_s4 }
  0x1d   :  { %p191_p0 = por %p190_p13, %p189_p12 }
  0x1f   :  { %p192_p1 = pnand %p191_p0, %p185_p11 }
  0x21   :  { %195 = shalt.err (!%p192_p1)
}
  0x22   :  { %41 = dma.hbm_to_vmem [thread:$0]  %s285_s1, 256, %s36_s24, [#allocation7], %s225_s19, %s225_s19, %s226_s20  }
  0x23   :  { %218 = dma.done.wait [#allocation4], 256  }
  0x24   :  { %219 = vsyncadd [#allocation4], 4294967040 }
  0x25   :  { %220 = dma.done.wait [#allocation7], 256  }
  0x26   :  { %221 = vsyncadd [#allocation7], 4294967040  ;;  %v58_v0 = vld [vmem:[#allocation3] sm:$0xff]  ;;  %v59_v1 = vld [vmem:[#allocation3 + $0x8] sm:$0xff]  ;;  %vm97_vm0 = vcmask 7168   ;;  %vm56_vm1 = vcmask 0  }
  0x27   :  { %62 = vmax.xlane.f32.xlu0 %v58_v0  ;;  %v60_v2 = vld [vmem:[#allocation6] sm:$0xff]  ;;  %v61_v12 = vld [vmem:[#allocation6 + $0x8] sm:$0xff]  ;;  %v228_v33 = vmov 0.0   ;;  %s229_s6 = smov [#allocation8]  }
  0x28   :  { %v84_v3 = vmul.f32 %v60_v2, %v58_v0  ;;  %v85_v13 = vmul.f32 %v61_v12, %v59_v1  ;;  %57 = vst.msk [vmem:[#allocation2] sm:$0x1] %vm56_vm1, %v228_v33  ;;  %s126_s7 = sshll.u32 %s229_s6, 4  ;;  %s127_s7 = int_to_ptr.vmem [resolvable:$true] %s126_s7 }
  0x29   :  { %s196_s8 = scalar_lea.vmem %s127_s7, 16  ;;  %s200_s9 = scalar_lea.vmem %s127_s7, 32 }
  0x2a   :  { %p197_p2 = scmp.ne.s32.totalorder %s127_s7, %s196_s8  ;;  %p201_p3 = scmp.lt.s32.totalorder %s127_s7, %s127_s7 }
  0x2b   :  { %64 = vmax.xlane.f32.xlu0 %v59_v1  ;;  %p202_p4 = scmp.lt.s32.totalorder %s200_s9, %s196_s8 }
  0x2d   :  { %p203_p5 = por %p202_p4, %p201_p3 }
  0x2f   :  { %80 = vadd.xlane.f32.xlu0 %v60_v2  ;;  %v96_v41 = vld [vmem:[#allocation2] sm:$0x1]  ;;  %p204_p6 = pnand %p203_p5, %p197_p2 }
  0x33   :  { %86 = vadd.xlane.f32.xlu0 %v84_v3 }
  0xb4   :  { %v63_v4 = vpop.xlane.xlu0 %62 }
  0xb5   :  { %v66_v5 = vsub.f32 %v58_v0, %v63_v4 }
  0xb7   :  { %v68_v6 = vmul.f32 1.442695, %v66_v5 }
  0xb8   :  { %v65_v7 = vpop.xlane.xlu0 %64 }
  0xb9   :  { %v67_v8 = vsub.f32 %v59_v1, %v65_v7  ;;  %144 = vpow2.f32 %v68_v6 }
  0xbb   :  { %v70_v9 = vmul.f32 1.442695, %v67_v8 }
  0xbc   :  { %v81_v17 = vpop.xlane.xlu0 %80 }
  0xbd   :  { %146 = vpow2.f32 %v70_v9 }
  0xc0   :  { %v87_v24 = vpop.xlane.xlu0 %86 }
  0xc3   :  { %v145_v10 = vpop.eup %144 }
  0xc4   :  { %72 = vadd.xlane.f32.xlu1 %v145_v10 }
  0xc7   :  { %v147_v11 = vpop.eup %146 }
  0xc8   :  { %74 = vadd.xlane.f32.xlu1 %v147_v11 }
  0xcc   :  { %82 = vadd.xlane.f32.xlu1 %v61_v12 }
  0xd0   :  { %88 = vadd.xlane.f32.xlu1 %v85_v13 }
 0x151   :  { %v73_v14 = vpop.xlane.xlu1 %72 }
 0x152   :  { %148 = vlog2.f32 %v73_v14 }
 0x155   :  { %v75_v15 = vpop.xlane.xlu1 %74 }
 0x156   :  { %150 = vlog2.f32 %v75_v15 }
 0x159   :  { %v83_v19 = vpop.xlane.xlu1 %82 }
 0x15c   :  { %v149_v16 = vpop.eup %148 }
 0x15d   :  { %v77_v18 = vmul.f32 0.6931472, %v149_v16  ;;  %v89_v26 = vpop.xlane.xlu1 %88 }
 0x15f   :  { %v90_v20 = vadd.f32 %v77_v18, %v63_v4 }
 0x160   :  { %v151_v21 = vpop.eup %150 }
 0x161   :  { %v79_v22 = vmul.f32 0.6931472, %v151_v21  ;;  %v92_v23 = vmul.f32 %v90_v20, %v81_v17 }
 0x163   :  { %v91_v25 = vadd.f32 %v79_v22, %v65_v7  ;;  %v94_v28 = vsub.f32 %v92_v23, %v87_v24 }
 0x165   :  { %v93_v27 = vmul.f32 %v91_v25, %v83_v19  ;;  %v98_v30 = vsel %vm97_vm0, %v94_v28, 0.0 }
 0x167   :  { %v95_v29 = vsub.f32 %v93_v27, %v89_v26 }
 0x169   :  { %v99_v31 = vsel %vm97_vm0, %v95_v29, 0.0 }
 0x16a   :  { %v100_v32 = vadd.f32 %v99_v31, %v98_v30 }
 0x16c   :  { %101 = vadd.xlane.f32.xlu0 %v100_v32 }
 0x1f9   :  { %v102_v34 = vpop.xlane.xlu0 %101 }
 0x1fa   :  { %v103_v35 = vrot.slane %v102_v34, 4 }
 0x1fc   :  { %v104_v36 = vadd.f32 %v103_v35, %v102_v34 }
 0x1fe   :  { %v105_v37 = vrot.slane %v104_v36, 2 }
 0x200   :  { %v106_v38 = vadd.f32 %v105_v37, %v104_v36 }
 0x202   :  { %v107_v39 = vrot.slane %v106_v38, 1 }
 0x204   :  { %v108_v40 = vadd.f32 %v107_v39, %v106_v38 }
 0x206   :  { %136 = vpush %v108_v40 }
 0x237   :  { %s137_s1 = spop %136 }
 0x238   :  { %v110_v42 = vstv %s137_s1 }
 0x239   :  { %v111_v43 = vadd.f32 %v110_v42, %v96_v41 }
 0x23b   :  { %113 = vst.msk [vmem:[#allocation2] sm:$0x1] %vm56_vm1, %v111_v43 }
 0x242   :  { %v117_v44 = vld [vmem:[#allocation2] sm:$0x1] }
 0x243   :  { %v118_v45 = vmul.f32 0.0625, %v117_v44 }
 0x245   :  { %119 = vst.msk [vmem:[#allocation8] sm:$0x1] %vm56_vm1, %v118_v45 }
 0x246   :  { %207 = shalt.err (!%p204_p6)
}
 0x247   :  { %s208_s12 = scalar_lea.hbm %s286_s2, 16 }
 0x248   :  { %p209_p7 = scmp.ne.s32.totalorder %s286_s2, %s208_s12  ;;  %p212_p8 = scmp.lt.u32.totalorder %s208_s12, %s286_s2 }
 0x24a   :  { %p214_p9 = pnand %p212_p8, %p209_p7 }
 0x24c   :  { %217 = shalt.err (!%p214_p9)
}
 0x24d   :  { %129 = dma.vmem_to_hbm [thread:$0]  %s127_s7, 16, %s286_s2, [#allocation5]  }
 0x24e   :  { %222 = dma.done.wait [#allocation5], 16  }
 0x24f   :  { %223 = vsyncadd [#allocation5], 4294967280 }
 0x250   :  { %133 = vsyncpa [#allocation4], 1 }
 0x251   :  { %134 = vsyncpa [#allocation7], 1 }
 0x252   :  { %135 = vsyncpa [#allocation5], 1 }

</bundles_post_ra>
